<compile_context>
chip_gen: v7x
topology: tpu7x:2x2x1
jax: 0.10.0
libtpu: 0.0.40
codegen_flags: <defaults>
</compile_context>

<pallas_src>
import jax
import jax.numpy as jnp
from jax.experimental import pallas as pl
from jax.experimental.pallas import tpu as pltpu

# original (unpadded) layer sizes from the PyTorch module
IN_F, H1, H2, OUT_F = 2, 10, 5, 4

PACK = 64                  # samples packed per row: 64 * IN_F = 128 lanes in
LANES_IN = PACK * IN_F     # 128
LANES_OUT = PACK * OUT_F   # 256
ROW_ALIGN = 8              # sublane granularity on packed rows
MAX_TR = 4096              # packed-row tile: in 2 MiB + out 4 MiB per block,
                           # ~12.2 MiB double-buffered -> fits v5e/v6e/v7x
FAST_PATH_MAX_B = 4096     # below this, plain XLA dot+add is strictly faster


def _packed_affine_kernel(x_ref, w_ref, b_ref, o_ref):
    # x_ref: (tr, 128) packed samples; w_ref: (128, 256) block-diag expanded
    # folded weight (resident across grid steps); b_ref: (1, 256) tiled bias.
    o_ref[...] = (
        jnp.dot(x_ref[...], w_ref[...], preferred_element_type=jnp.float32)
        + b_ref[...]
    )


def prepare_params(params):
    """One-time prep (hoisted out of the per-call forward):
    1) fold the three activation-free Linear layers into y = x @ Wc + bc;
    2) expand Wc into a (128, 256) block-diagonal matrix so 64 samples can be
       processed per lane-dense packed row, and tile bc to (1, 256)."""
    w1t = params["w1"].T.astype(jnp.float32)   # (2, 10)
    w2t = params["w2"].T.astype(jnp.float32)   # (10, 5)
    w3t = params["w3"].T.astype(jnp.float32)   # (5, 4)
    wc = w1t @ w2t @ w3t                       # (2, 4)
    bc = (params["b1"] @ w2t @ w3t + params["b2"] @ w3t + params["b3"])
    bc = bc.reshape(1, OUT_F).astype(jnp.float32)          # (1, 4)

    # W_big[2k+i, 4k+j] = Wc[i, j]  (block-diagonal over k = 0..63)
    w_big = jnp.einsum("kl,ij->kilj", jnp.eye(PACK, dtype=jnp.float32), wc)
    w_big = w_big.reshape(LANES_IN, LANES_OUT)              # (128, 256)
    b_big = jnp.tile(bc, (1, PACK))                         # (1, 256)
    return wc, bc, w_big, b_big


def multi_classifier_forward(x, prepared, *, use_kernel=None):
    """x: (B, 2) float32. prepared: output of prepare_params."""
    wc, bc, w_big, b_big = prepared
    B = x.shape[0]

    if use_kernel is None:
        use_kernel = B >= FAST_PATH_MAX_B
    if not use_kernel:
        # tiny-batch fast path: fused XLA dot+add, no pad/launch/slice cost
        return x @ wc + bc

    # pad only the tail so packed rows are a multiple of 8 sublanes
    rows = pl.cdiv(B, PACK)
    rp = pl.cdiv(rows, ROW_ALIGN) * ROW_ALIGN
    bp = rp * PACK
    if bp != B:
        x = jnp.pad(x, ((0, bp - B), (0, 0)))   # at most 511 extra rows
    xp = x.reshape(rp, LANES_IN)                # contiguous reshape, free

    # row tile: as large as allowed, but keep >= 2 grid steps when possible so
    # the "parallel" axis can shard across v7x's two TensorCores.
    tr = min(MAX_TR, rp)
    if rp >= 2 * ROW_ALIGN:
        tr = min(tr, pl.cdiv(pl.cdiv(rp, 2), ROW_ALIGN) * ROW_ALIGN)
    grid = (pl.cdiv(rp, tr),)

    out = pl.pallas_call(
        _packed_affine_kernel,
        out_shape=jax.ShapeDtypeStruct((rp, LANES_OUT), jnp.float32),
        grid=grid,
        in_specs=[
            pl.BlockSpec((tr, LANES_IN), lambda i: (i, 0)),          # x tile
            pl.BlockSpec((LANES_IN, LANES_OUT), lambda i: (0, 0)),   # W_big (resident)
            pl.BlockSpec((1, LANES_OUT), lambda i: (0, 0)),          # b_big (resident)
        ],
        out_specs=pl.BlockSpec((tr, LANES_OUT), lambda i: (i, 0)),
        compiler_params=pltpu.CompilerParams(
            dimension_semantics=("parallel",),
            vmem_limit_bytes=32 << 20,
        ),
    )(xp, w_big, b_big)

    return out.reshape(bp, OUT_F)[:B]


def init_params(key):
    """Deterministic init mimicking nn.Linear (uniform +/- 1/sqrt(fan_in))."""
    ks = jax.random.split(key, 6)

    def lin(kw, kb, fan_in, fan_out):
        bound = 1.0 / jnp.sqrt(fan_in)
        w = jax.random.uniform(kw, (fan_out, fan_in), jnp.float32, -bound, bound)
        b = jax.random.uniform(kb, (fan_out,), jnp.float32, -bound, bound)
        return w, b

    w1, b1 = lin(ks[0], ks[1], IN_F, H1)
    w2, b2 = lin(ks[2], ks[3], H1, H2)
    w3, b3 = lin(ks[4], ks[5], H2, OUT_F)
    return {"w1": w1, "b1": b1, "w2": w2, "b2": b2, "w3": w3, "b3": b3}


def reference_forward(x, p):
    """Pure-JAX reference, exactly mirroring the PyTorch layer-by-layer forward."""
    h = x @ p["w1"].T + p["b1"]
    h = h @ p["w2"].T + p["b2"]
    return h @ p["w3"].T + p["b3"]


if __name__ == "__main__":
    key = jax.random.PRNGKey(0)
    kx, kp, kx2 = jax.random.split(key, 3)

    params = init_params(kp)
    prepared = prepare_params(params)   # one-time weight fold + lane-pack expansion

    # small batch consistent with the module spec -- force the Pallas path
    B = 2
    x = jax.random.normal(kx, (B, IN_F), jnp.float32)
    out = jax.block_until_ready(
        multi_classifier_forward(x, prepared, use_kernel=True))
    ref = reference_forward(x, params)
    assert out.shape == (B, OUT_F), out.shape
    assert jnp.allclose(out, ref, atol=1e-5, rtol=1e-5), (out, ref)

    # non-tile-multiple batch exercising a multi-step (>=2) grid
    B2 = 2000
    x2 = jax.random.normal(kx2, (B2, IN_F), jnp.float32)
    out2 = jax.block_until_ready(
        multi_classifier_forward(x2, prepared, use_kernel=True))
    ref2 = reference_forward(x2, params)
    assert out2.shape == (B2, OUT_F), out2.shape
    assert jnp.allclose(out2, ref2, atol=1e-5, rtol=1e-5)

    # tiny-batch fast path (plain XLA) also matches
    out3 = jax.block_until_ready(multi_classifier_forward(x, prepared))
    assert jnp.allclose(out3, ref, atol=1e-5, rtol=1e-5)

    print("KERNEL_OK")
</pallas_src>

<mosaic_0001>
module attributes {stable_mosaic.version = 11 : i64} {
  func.func @_packed_affine_kernel(%arg0: i32, %arg1: memref<8x128xf32, #tpu.memory_space<vmem>>, %arg2: memref<128x256xf32, #tpu.memory_space<vmem>>, %arg3: memref<1x256xf32, #tpu.memory_space<vmem>>, %arg4: memref<8x256xf32, #tpu.memory_space<vmem>>) attributes {dimension_semantics = [#tpu.dimension_semantics<parallel>], iteration_bounds = array<i64: 1>, scalar_prefetch = 0 : i64, scratch_operands = 0 : i64, tpu.core_type = #tpu.core_type<tc>, window_params = [{transform_indices = @transform_0, window_bounds = array<i64: 8, 128>}, {pipeline_mode = #tpu.pipeline_mode<synchronous>, transform_indices = @transform_1, window_bounds = array<i64: 128, 256>}, {pipeline_mode = #tpu.pipeline_mode<synchronous>, transform_indices = @transform_2, window_bounds = array<i64: 1, 256>}, {transform_indices = @transform_3, window_bounds = array<i64: 8, 256>}]} {
    %c0 = arith.constant 0 : index
    %c0_0 = arith.constant 0 : index
    %0 = vector.load %arg1[%c0, %c0_0] : memref<8x128xf32, #tpu.memory_space<vmem>>, vector<8x128xf32>
    %c0_1 = arith.constant 0 : index
    %c0_2 = arith.constant 0 : index
    %1 = vector.load %arg2[%c0_1, %c0_2] : memref<128x256xf32, #tpu.memory_space<vmem>>, vector<128x256xf32>
    %cst = arith.constant dense<0.000000e+00> : vector<8x256xf32>
    %2 = tpu.matmul %0, %1, %cst {dimension_numbers = #tpu.dot_dimension_numbers<[1], [0], [0], [1], [0, 0, 1, 1], [], []>} : vector<8x128xf32>, vector<128x256xf32>, vector<8x256xf32> -> vector<8x256xf32>
    %c0_3 = arith.constant 0 : index
    %c0_4 = arith.constant 0 : index
    %3 = vector.load %arg3[%c0_3, %c0_4] : memref<1x256xf32, #tpu.memory_space<vmem>>, vector<1x256xf32>
    %4 = vector.broadcast %3 : vector<1x256xf32> to vector<8x256xf32>
    %5 = arith.addf %2, %4 : vector<8x256xf32>
    %c0_5 = arith.constant 0 : index
    %c0_6 = arith.constant 0 : index
    %6 = vector.load %arg4[%c0_5, %c0_6] : memref<8x256xf32, #tpu.memory_space<vmem>>, vector<8x256xf32>
    tpu.vector_store %arg4[%c0_5, %c0_6], %5 {strides = array<i32>} : memref<8x256xf32, #tpu.memory_space<vmem>>, vector<8x256xf32>,
    return
  }
  func.func @transform_0(%arg0: i32) -> (i32, i32) {
    %c0_i32 = arith.constant 0 : i32
    %c0_i32_0 = arith.constant 0 : i32
    return %arg0, %c0_i32 : i32, i32
  }
  func.func @transform_1(%arg0: i32) -> (i32, i32) {
    %c0_i32 = arith.constant 0 : i32
    %c0_i32_0 = arith.constant 0 : i32
    %c0_i32_1 = arith.constant 0 : i32
    return %c0_i32, %c0_i32_0 : i32, i32
  }
  func.func @transform_2(%arg0: i32) -> (i32, i32) {
    %c0_i32 = arith.constant 0 : i32
    %c0_i32_0 = arith.constant 0 : i32
    %c0_i32_1 = arith.constant 0 : i32
    return %c0_i32, %c0_i32_0 : i32, i32
  }
  func.func @transform_3(%arg0: i32) -> (i32, i32) {
    %c0_i32 = arith.constant 0 : i32
    %c0_i32_0 = arith.constant 0 : i32
    return %arg0, %c0_i32 : i32, i32
  }
}

</mosaic_0001>

<bundles_post_ra>
// kernel: tpu_custom_call.1
= control target key start
LH: loop header
LB: loop body
LE: loop exit
PB: predicated region body
PF: predicated region fallthrough
CT: control target
= control target key end

     0   :  { %8 = vsyncpa [#allocation3], 0  ;;  %s357_s0 = inlined_call_operand.hbm [shape: f32[8,128], index: 0, kind: input, shape index: {}]   ;;  %s358_s1 = inlined_call_operand.hbm [shape: f32[128,256], index: 1, kind: input, shape index: {}]   ;;  %s359_s2 = inlined_call_operand.vmem [shape: f32[1,256], index: 2, kind: input, shape index: {}]   ;;  %s360_s3 = inlined_call_operand.hbm [shape: f32[8,256], index: 3, kind: output, shape index: {}]  }
   0x1   :  { %9 = vsyncpa [#allocation6], 0 }
   0x2   :  { %10 = vsyncpa [#allocation4], 0  ;;  %s285_s12 = smov [#allocation2]   ;;  %s286_s14 = smov [#allocation5]  }
   0x3   :  { %s17_s13 = sshll.u32 %s285_s12, 4  ;;  %s26_s15 = sshll.u32 %s286_s14, 4  ;;  %s18_s13 = int_to_ptr.vmem [resolvable:$true] %s17_s13  ;;  %s311_s15 = int_to_ptr.vmem [resolvable:$true] %s26_s15 }
   0x4   :  { %s213_s18 = scalar_lea.hbm %s357_s0, 128 }
   0x5   :  { %p214_p0 = scmp.ne.s32.totalorder %s357_s0, %s213_s18  ;;  %p217_p1 = scmp.lt.u32.totalorder %s213_s18, %s357_s0 }
   0x7   :  { %p219_p2 = pnand %p217_p1, %p214_p0 }
   0x9   :  { %222 = shalt.err (!%p219_p2)
}
   0xa   :  { %s223_s23 = scalar_lea.vmem %s18_s13, 128  ;;  %p228_p4 = scmp.lt.s32.totalorder %s18_s13, %s18_s13 }
   0xb   :  { %p224_p3 = scmp.ne.s32.totalorder %s18_s13, %s223_s23  ;;  %p229_p5 = scmp.lt.s32.totalorder %s223_s23, %s223_s23 }
   0xd   :  { %p230_p6 = por %p229_p5, %p228_p4 }
   0xf   :  { %p231_p7 = pnand %p230_p6, %p224_p3 }
  0x11   :  { %234 = shalt.err (!%p231_p7)
}
  0x12   :  { %20 = dma.hbm_to_vmem [thread:$0]  %s357_s0, 128, %s18_s13, [#allocation3]  }
  0x13   :  { %s235_s28 = scalar_lea.hbm %s358_s1, 4096 }
  0x14   :  { %p236_p8 = scmp.ne.s32.totalorder %s358_s1, %s235_s28  ;;  %p239_p9 = scmp.lt.u32.totalorder %s235_s28, %s358_s1 }
  0x16   :  { %p241_p10 = pnand %p239_p9, %p236_p8 }
  0x18   :  { %244 = shalt.err (!%p241_p10)
}
  0x19   :  { %s245_s6 = scalar_lea.vmem %s311_s15, 4096  ;;  %p250_p12 = scmp.lt.s32.totalorder %s311_s15, %s311_s15 }
  0x1a   :  { %p246_p11 = scmp.ne.s32.totalorder %s311_s15, %s245_s6  ;;  %p251_p13 = scmp.lt.s32.totalorder %s245_s6, %s245_s6 }
  0x1c   :  { %p252_p0 = por %p251_p13, %p250_p12 }
  0x1e   :  { %p253_p1 = pnand %p252_p0, %p246_p11 }
  0x20   :  { %256 = shalt.err (!%p253_p1)
}
  0x21   :  { %s287_s0 = smov 256   ;;  %s288_s7 = smov 16  }
  0x22   :  { %32 = dma.hbm_to_vmem [thread:$0]  %s358_s1, 4096, %s311_s15, [#allocation6], %s287_s0, %s287_s0, %s288_s7  }
  0x23   :  { %279 = dma.done.wait [#allocation3], 128  }
  0x24   :  { %280 = vsyncadd [#allocation3], 4294967168 }
  0x25   :  { %281 = dma.done.wait [#allocation6], 4096  }
  0x26   :  { %282 = vsyncadd [#allocation6], 4294963200  ;;  %v289_v0 = vmov 0.0   ;;  %v43_v1 = vld [vmem:[#allocation5 + $0x8] sm:$0xff]  ;;  %v45_v2 = vld [vmem:[#allocation5 + $0x18] sm:$0xff]  ;;  %v76_v50 = vlaneseq  ;;  %s290_s11 = smov [#allocation7]  }
  0x27   :  { %150 = vmatprep.mubr.f32.mxu0 %v289_v0  ;;  %v42_v3 = vld [vmem:[#allocation5] sm:$0xff]  ;;  %v175_v4 = vpack.c.bf16 %v45_v2, %v43_v1  ;;  %v44_v5 = vld [vmem:[#allocation5 + $0x10] sm:$0xff]  ;;  %v47_v6 = vld [vmem:[#allocation5 + $0x28] sm:$0xff]  ;;  %s165_s12 = sshll.u32 %s290_s11, 4  ;;  %s166_s12 = int_to_ptr.vmem [resolvable:$true] %s165_s12 }
  0x28   :  { %v49_v7 = vld [vmem:[#allocation5 + $0x38] sm:$0xff]  ;;  %v177_v8 = vpack.c.bf16 %v44_v5, %v42_v3  ;;  %v46_v10 = vld [vmem:[#allocation5 + $0x20] sm:$0xff]  ;;  %v48_v11 = vld [vmem:[#allocation5 + $0x30] sm:$0xff]  ;;  %v77_v51 = vshrl.u32 %v76_v50, 7  ;;  %s257_s13 = scalar_lea.vmem %s166_s12, 256  ;;  %p262_p3 = scmp.lt.s32.totalorder %s166_s12, %s166_s12 }
  0x29   :  { %v179_v9 = vpack.c.bf16 %v49_v7, %v47_v6  ;;  %v51_v12 = vld [vmem:[#allocation5 + $0x48] sm:$0xff]  ;;  %176 = vmatprep.subr.bf16.mxu0 %v175_v4  ;;  %v53_v13 = vld [vmem:[#allocation5 + $0x58] sm:$0xff]  ;;  %v181_v14 = vpack.c.bf16 %v48_v11, %v46_v10  ;;  %v50_v16 = vld [vmem:[#allocation5 + $0x40] sm:$0xff]  ;;  %p258_p2 = scmp.ne.s32.totalorder %s166_s12, %s257_s13  ;;  %p263_p4 = scmp.lt.s32.totalorder %s257_s13, %s257_s13 }
  0x2a   :  { %178 = vmatpush1.bf16.msra.mxu0 %v177_v8  ;;  %v183_v15 = vpack.c.bf16 %v53_v13, %v51_v12  ;;  %v52_v17 = vld [vmem:[#allocation5 + $0x50] sm:$0xff]  ;;  %v55_v18 = vld [vmem:[#allocation5 + $0x68] sm:$0xff]  ;;  %v57_v19 = vld [vmem:[#allocation5 + $0x78] sm:$0xff]  ;;  %v78_v52 = vsub.s32 0, %v77_v51  ;;  %v82_v54 = vsub.s32 1, %v77_v51 }
  0x2b   :  { %180 = vmatprep.subr.bf16.mxu0 %v179_v9  ;;  %v185_v20 = vpack.c.bf16 %v52_v17, %v50_v16  ;;  %v187_v21 = vpack.c.bf16 %v57_v19, %v55_v18  ;;  %v54_v22 = vld [vmem:[#allocation5 + $0x60] sm:$0xff]  ;;  %v56_v23 = vld [vmem:[#allocation5 + $0x70] sm:$0xff]  ;;  %v59_v24 = vld [vmem:[#allocation5 + $0x88] sm:$0xff]  ;;  %p264_p5 = por %p263_p4, %p262_p3 }
  0x2c   :  { %v61_v25 = vld [vmem:[#allocation5 + $0x98] sm:$0xff]  ;;  %v189_v26 = vpack.c.bf16 %v56_v23, %v54_v22  ;;  %v58_v28 = vld [vmem:[#allocation5 + $0x80] sm:$0xff]  ;;  %v60_v29 = vld [vmem:[#allocation5 + $0x90] sm:$0xff] }
  0x2d   :  { %v191_v27 = vpack.c.bf16 %v61_v25, %v59_v24  ;;  %v63_v30 = vld [vmem:[#allocation5 + $0xa8] sm:$0xff]  ;;  %v65_v31 = vld [vmem:[#allocation5 + $0xb8] sm:$0xff]  ;;  %v193_v32 = vpack.c.bf16 %v60_v29, %v58_v28  ;;  %v62_v34 = vld [vmem:[#allocation5 + $0xa0] sm:$0xff]  ;;  %p265_p6 = pnand %p264_p5, %p258_p2 }
  0x2e   :  { %182 = vmatpush1.bf16.msra.mxu0 %v181_v14  ;;  %v195_v33 = vpack.c.bf16 %v65_v31, %v63_v30  ;;  %v64_v35 = vld [vmem:[#allocation5 + $0xb0] sm:$0xff]  ;;  %v67_v36 = vld [vmem:[#allocation5 + $0xc8] sm:$0xff]  ;;  %v69_v37 = vld [vmem:[#allocation5 + $0xd8] sm:$0xff] }
  0x2f   :  { %184 = vmatprep.subr.bf16.mxu0 %v183_v15  ;;  %v197_v38 = vpack.c.bf16 %v64_v35, %v62_v34  ;;  %v199_v39 = vpack.c.bf16 %v69_v37, %v67_v36  ;;  %v66_v40 = vld [vmem:[#allocation5 + $0xc0] sm:$0xff]  ;;  %v68_v41 = vld [vmem:[#allocation5 + $0xd0] sm:$0xff]  ;;  %v71_v42 = vld [vmem:[#allocation5 + $0xe8] sm:$0xff] }
  0x30   :  { %v73_v43 = vld [vmem:[#allocation5 + $0xf8] sm:$0xff]  ;;  %v201_v44 = vpack.c.bf16 %v68_v41, %v66_v40  ;;  %v70_v46 = vld [vmem:[#allocation5 + $0xe0] sm:$0xff]  ;;  %v72_v47 = vld [vmem:[#allocation5 + $0xf0] sm:$0xff] }
  0x31   :  { %v203_v45 = vpack.c.bf16 %v73_v43, %v71_v42  ;;  %v205_v48 = vpack.c.bf16 %v72_v47, %v70_v46  ;;  %v41_v49 = vld [vmem:[#allocation2] sm:$0xff] }
  0x32   :  { %186 = vmatpush1.bf16.msra.mxu0 %v185_v20  ;;  %v74_v53 = vld [vmem:[%s359_s2] sm:$0x3] }
  0x33   :  { %188 = vmatprep.subr.bf16.mxu0 %v187_v21  ;;  %v79_v55 = vrot.slane %v74_v53, %v78_v52  ;;  %v83_v56 = vrot.slane %v74_v53, %v82_v54 }
  0x36   :  { %190 = vmatpush1.bf16.msra.mxu0 %v189_v26 }
  0x37   :  { %192 = vmatprep.subr.bf16.mxu0 %v191_v27 }
  0x3a   :  { %194 = vmatpush1.bf16.msra.mxu0 %v193_v32 }
  0x3b   :  { %196 = vmatprep.subr.bf16.mxu0 %v195_v33 }
  0x3e   :  { %198 = vmatpush1.bf16.msra.mxu0 %v197_v38 }
  0x3f   :  { %200 = vmatprep.subr.bf16.mxu0 %v199_v39 }
  0x42   :  { %202 = vmatpush1.bf16.msra.mxu0 %v201_v44 }
  0x43   :  { %204 = vmatprep.subr.bf16.mxu0 %v203_v45 }
  0x46   :  { %206 = vmatpush1.bf16.msra.mxu0 %v205_v48 }
  0x49   :  { %151 = vmatmul.mubr.f32.vlgmr.msra.gmra.mrb[0].mxu0 %v41_v49 }
 0x11c   :  { %v152_v57 = vpop.f32.mrb[0].mxu0 }
 0x11d   :  { %v153_v58 = vadd.f32 %v152_v57, %v79_v55  ;;  %v154_v59 = vpop.f32.mrb[1].mxu0 }
 0x11e   :  { %v155_v60 = vadd.f32 %v154_v59, %v83_v56 }
 0x11f   :  { %157 = vst [vmem:[#allocation7] sm:$0xff] %v153_v58 }
 0x120   :  { %158 = vst [vmem:[#allocation7 + $0x8] sm:$0xff] %v155_v60 }
 0x121   :  { %268 = shalt.err (!%p265_p6)
}
 0x122   :  { %s269_s15 = scalar_lea.hbm %s360_s3, 256 }
 0x123   :  { %p270_p7 = scmp.ne.s32.totalorder %s360_s3, %s269_s15  ;;  %p273_p8 = scmp.lt.u32.totalorder %s269_s15, %s360_s3 }
 0x125   :  { %p275_p9 = pnand %p273_p8, %p270_p7 }
 0x127   :  { %278 = shalt.err (!%p275_p9)
}
 0x128   :  { %168 = dma.vmem_to_hbm [thread:$0]  %s166_s12, 256, %s360_s3, [#allocation4]  }
 0x129   :  { %283 = dma.done.wait [#allocation4], 256  }
 0x12a   :  { %284 = vsyncadd [#allocation4], 4294967040 }
 0x12b   :  { %172 = vsyncpa [#allocation3], 1 }
 0x12c   :  { %173 = vsyncpa [#allocation6], 1 }
 0x12d   :  { %174 = vsyncpa [#allocation4], 1 }

</bundles_post_ra>
